<compile_context>
chip_gen: v7x
topology: tpu7x:2x2x1
jax: 0.10.0
libtpu: 0.0.40
codegen_flags: <defaults>
</compile_context>

<pallas_src>
import functools

import jax
import jax.numpy as jnp
from jax import lax
from jax.experimental import pallas as pl
from jax.experimental.pallas import tpu as pltpu


def lossA_kernel(x_ref, w_ref, bd_ref, lab_ref, out_ref, *, batch, tile_b,
                 num_tiles):
    i = pl.program_id(0)
    is_last = i == num_tiles - 1

    @pl.when(i == 0)
    def _():
        out_ref[...] = jnp.zeros_like(out_ref)

    # (8, tile_b) = wproj(8,128) · x(tile_b,128)^T on the MXU.  Only row 0 of
    # wproj is meaningful (it holds w1 - w0); rows 1..7 are zero padding so
    # the lhs is sublane-aligned.  Batch lands on the lane axis.
    prod = lax.dot_general(
        w_ref[...], x_ref[...],
        dimension_numbers=(((1,), (1,)), ((), ())),
        preferred_element_type=jnp.float32)
    d = prod[0:1, :] + bd_ref[0]                     # (1, tb): (z1-z0)+(b1-b0)

    # 2-class closed form: CE = softplus(+d) if label==0 else softplus(-d).
    t = jnp.where(lab_ref[...] == 0, d, -d)          # (1, tb) f32
    per_sample = jnp.maximum(t, 0.0) + jnp.log(1.0 + jnp.exp(-jnp.abs(t)))

    if batch % tile_b != 0:
        # Only the last tile straddles the true batch boundary; interior tiles
        # skip the iota/compare/select entirely.
        @pl.when(jnp.logical_not(is_last))
        def _():
            out_ref[...] += jnp.sum(per_sample, keepdims=True)

        @pl.when(is_last)
        def _():
            ids = lax.broadcasted_iota(jnp.int32, per_sample.shape, 1) + i * tile_b
            masked = jnp.where(ids < batch, per_sample, 0.0)
            out_ref[...] += jnp.sum(masked, keepdims=True)
    else:
        out_ref[...] += jnp.sum(per_sample, keepdims=True)

    @pl.when(is_last)
    def _():
        out_ref[...] = out_ref[...] * jnp.float32(1.0 / batch)


def lossA_forward(x, labels, weight, bias, *, tile_b=8192):
    """x: (B, 1, 128), labels: (B,) int, weight: (2, 128), bias: (2,).
    Returns the scalar mean cross-entropy loss (f32)."""
    B = x.shape[0]
    F_IN = x.shape[-1]

    xs = x.reshape(B, F_IN)                      # squeeze(1); no copy/cast pass
    lab = labels.astype(jnp.int32).reshape(1, B)  # labels as a lane-dense row

    # Class-difference projection (row 0 = w1 - w0, rows 1..7 zero) and the
    # scalar bias difference (goes to SMEM).
    wproj = jnp.zeros((8, F_IN), jnp.float32).at[0].set(
        (weight[1] - weight[0]).astype(jnp.float32))
    bd = (bias[1] - bias[0]).astype(jnp.float32).reshape(1)

    tb = B if B <= tile_b else tile_b            # tile_b is 8/128-aligned
    num_tiles = pl.cdiv(B, tb)

    kernel = functools.partial(lossA_kernel, batch=B, tile_b=tb,
                               num_tiles=num_tiles)

    cost = pl.CostEstimate(
        flops=2 * B * F_IN * 8 + 10 * B,
        transcendentals=2 * B,
        bytes_accessed=B * F_IN * xs.dtype.itemsize + B * 4 + 8 * F_IN * 4 + 8,
    )

    out = pl.pallas_call(
        kernel,
        out_shape=jax.ShapeDtypeStruct((1, 1), jnp.float32),
        grid_spec=pltpu.PrefetchScalarGridSpec(
            num_scalar_prefetch=0,
            grid=(num_tiles,),
            in_specs=[
                pl.BlockSpec((tb, F_IN), lambda i: (i, 0)),          # x tile
                pl.BlockSpec((8, F_IN), lambda i: (0, 0)),           # wproj
                pl.BlockSpec(memory_space=pltpu.MemorySpace.SMEM),   # bias diff
                pl.BlockSpec((1, tb), lambda i: (0, i)),             # labels
            ],
            out_specs=pl.BlockSpec((1, 1), lambda i: (0, 0)),
        ),
        compiler_params=pltpu.CompilerParams(
            dimension_semantics=("arbitrary",),
            vmem_limit_bytes=32 * 1024 * 1024,
        ),
        cost_estimate=cost,
    )(xs, wproj, bd, lab)

    return out[0, 0]


def reference_loss(x, labels, weight, bias):
    xs = x.reshape(x.shape[0], x.shape[-1]).astype(jnp.float32)
    logits = xs @ weight.T + bias
    lse = jax.scipy.special.logsumexp(logits, axis=-1)
    picked = jnp.take_along_axis(logits, labels.reshape(-1, 1), axis=-1)[:, 0]
    return jnp.mean(lse - picked)


if __name__ == "__main__":
    key = jax.random.PRNGKey(0)
    kx, kl, kw, kb = jax.random.split(key, 4)

    B, F_IN, F_OUT = 8, 128, 2

    x = jax.random.normal(kx, (B, 1, F_IN), dtype=jnp.float32)
    labels = jax.random.randint(kl, (B,), 0, F_OUT, dtype=jnp.int32)

    # Deterministic synthetic FC parameters (nn.Linear(128, 2) shapes).
    bound = 1.0 / (F_IN ** 0.5)
    weight = jax.random.uniform(kw, (F_OUT, F_IN), jnp.float32, -bound, bound)
    bias = jax.random.uniform(kb, (F_OUT,), jnp.float32, -bound, bound)

    loss = lossA_forward(x, labels, weight, bias)
    jax.block_until_ready(loss)

    ref = reference_loss(x, labels, weight, bias)
    # Full f32 path in the kernel -> tight tolerance vs the f32 reference.
    assert jnp.allclose(loss, ref, atol=1e-5, rtol=1e-5), (loss, ref)

    print("KERNEL_OK")
</pallas_src>

<mosaic_0001>
module attributes {stable_mosaic.version = 11 : i64} {
  func.func @lossA_kernel(%arg0: i32, %arg1: memref<8x128xf32, #tpu.memory_space<vmem>>, %arg2: memref<8x128xf32, #tpu.memory_space<vmem>>, %arg3: memref<1xf32, #tpu.memory_space<smem>>, %arg4: memref<1x8xi32, #tpu.memory_space<vmem>>, %arg5: memref<1x1xf32, #tpu.memory_space<vmem>>) attributes {dimension_semantics = [#tpu.dimension_semantics<arbitrary>], iteration_bounds = array<i64: 1>, scalar_prefetch = 0 : i64, scratch_operands = 0 : i64, tpu.core_type = #tpu.core_type<tc>, window_params = [{transform_indices = @transform_0, window_bounds = array<i64: 8, 128>}, {pipeline_mode = #tpu.pipeline_mode<synchronous>, transform_indices = @transform_1, window_bounds = array<i64: 8, 128>}, {transform_indices = @transform_2, window_bounds = array<i64: 1>}, {transform_indices = @transform_3, window_bounds = array<i64: 1, 8>}, {pipeline_mode = #tpu.pipeline_mode<synchronous>, transform_indices = @transform_4, window_bounds = array<i64: 1, 1>}]} {
    %c0_i32 = arith.constant 0 : i32
    %0 = arith.cmpi eq, %arg0, %c0_i32 : i32
    %c0_i32_0 = arith.constant 0 : i32
    %1 = arith.cmpi eq, %arg0, %c0_i32_0 : i32
    %2 = arith.extui %1 : i1 to i32
    %c0_i32_1 = arith.constant 0 : i32
    %3 = arith.cmpi ne, %2, %c0_i32_1 : i32
    scf.if %3 {
      %cst_19 = arith.constant 0.000000e+00 : f32
      %37 = vector.broadcast %cst_19 : f32 to vector<1x1xf32>
      %c0_20 = arith.constant 0 : index
      %c0_21 = arith.constant 0 : index
      %38 = vector.load %arg5[%c0_20, %c0_21] : memref<1x1xf32, #tpu.memory_space<vmem>>, vector<1x1xf32>
      tpu.vector_store %arg5[%c0_20, %c0_21], %37 {strides = array<i32>} : memref<1x1xf32, #tpu.memory_space<vmem>>, vector<1x1xf32>,
    } else {
    }
    %c0 = arith.constant 0 : index
    %c0_2 = arith.constant 0 : index
    %4 = vector.load %arg2[%c0, %c0_2] : memref<8x128xf32, #tpu.memory_space<vmem>>, vector<8x128xf32>
    %c0_3 = arith.constant 0 : index
    %c0_4 = arith.constant 0 : index
    %5 = vector.load %arg1[%c0_3, %c0_4] : memref<8x128xf32, #tpu.memory_space<vmem>>, vector<8x128xf32>
    %cst = arith.constant dense<0.000000e+00> : vector<8x8xf32>
    %6 = tpu.matmul %4, %5, %cst {dimension_numbers = #tpu.dot_dimension_numbers<[1], [1], [0], [0], [0, 0, 1, 0], [], []>} : vector<8x128xf32>, vector<8x128xf32>, vector<8x8xf32> -> vector<8x8xf32>
    %7 = vector.extract_strided_slice %6 {offsets = [0, 0], sizes = [1, 8], strides = [1, 1]} : vector<8x8xf32> to vector<1x8xf32>
    %c0_5 = arith.constant 0 : index
    %8 = memref.load %arg3[%c0_5] : memref<1xf32, #tpu.memory_space<smem>>
    %9 = vector.broadcast %8 : f32 to vector<1x8xf32>
    %10 = arith.addf %7, %9 : vector<1x8xf32>
    %c0_6 = arith.constant 0 : index
    %c0_7 = arith.constant 0 : index
    %11 = vector.load %arg4[%c0_6, %c0_7] : memref<1x8xi32, #tpu.memory_space<vmem>>, vector<1x8xi32>
    %c0_i32_8 = arith.constant 0 : i32
    %12 = vector.broadcast %c0_i32_8 : i32 to vector<1x8xi32>
    %13 = arith.cmpi eq, %11, %12 : vector<1x8xi32>
    %cst_9 = arith.constant 0.000000e+00 : f32
    %14 = vector.broadcast %cst_9 : f32 to vector<1x8xf32>
    %15 = arith.subf %14, %10 : vector<1x8xf32>
    %16 = arith.select %13, %10, %15 : vector<1x8xi1>, vector<1x8xf32>
    %cst_10 = arith.constant 0.000000e+00 : f32
    %17 = vector.broadcast %cst_10 : f32 to vector<1x8xf32>
    %18 = arith.maximumf %16, %17 : vector<1x8xf32>
    %19 = math.absf %16 : vector<1x8xf32>
    %cst_11 = arith.constant 0.000000e+00 : f32
    %20 = vector.broadcast %cst_11 : f32 to vector<1x8xf32>
    %21 = arith.subf %20, %19 : vector<1x8xf32>
    %22 = math.exp %21 : vector<1x8xf32>
    %cst_12 = arith.constant 1.000000e+00 : f32
    %23 = vector.broadcast %cst_12 : f32 to vector<1x8xf32>
    %24 = arith.addf %23, %22 : vector<1x8xf32>
    %25 = math.log %24 : vector<1x8xf32>
    %26 = arith.addf %18, %25 : vector<1x8xf32>
    %c0_13 = arith.constant 0 : index
    %c0_14 = arith.constant 0 : index
    %27 = vector.load %arg5[%c0_13, %c0_14] : memref<1x1xf32, #tpu.memory_space<vmem>>, vector<1x1xf32>
    %28 = vector.shape_cast %26 : vector<1x8xf32> to vector<1x1x8xf32>
    %cst_15 = arith.constant dense<0.000000e+00> : vector<1xf32>
    %29 = vector.multi_reduction <add>, %28, %cst_15 [1, 2] : vector<1x1x8xf32> to vector<1xf32>
    %30 = vector.shape_cast %29 : vector<1xf32> to vector<1x1x1xf32>
    %31 = vector.extract %30[0, 0, 0] : f32 from vector<1x1x1xf32>
    %32 = vector.broadcast %31 : f32 to vector<1x1xf32>
    %33 = arith.addf %27, %32 : vector<1x1xf32>
    %c0_16 = arith.constant 0 : index
    %c0_17 = arith.constant 0 : index
    %34 = vector.load %arg5[%c0_16, %c0_17] : memref<1x1xf32, #tpu.memory_space<vmem>>, vector<1x1xf32>
    tpu.vector_store %arg5[%c0_16, %c0_17], %33 {strides = array<i32>} : memref<1x1xf32, #tpu.memory_space<vmem>>, vector<1x1xf32>,
    %35 = arith.extui %0 : i1 to i32
    %c0_i32_18 = arith.constant 0 : i32
    %36 = arith.cmpi ne, %35, %c0_i32_18 : i32
    scf.if %36 {
      %c0_19 = arith.constant 0 : index
      %c0_20 = arith.constant 0 : index
      %37 = vector.load %arg5[%c0_19, %c0_20] : memref<1x1xf32, #tpu.memory_space<vmem>>, vector<1x1xf32>
      %cst_21 = arith.constant 1.250000e-01 : f32
      %38 = vector.broadcast %cst_21 : f32 to vector<1x1xf32>
      %39 = arith.mulf %37, %38 : vector<1x1xf32>
      %c0_22 = arith.constant 0 : index
      %c0_23 = arith.constant 0 : index
      %40 = vector.load %arg5[%c0_22, %c0_23] : memref<1x1xf32, #tpu.memory_space<vmem>>, vector<1x1xf32>
      tpu.vector_store %arg5[%c0_22, %c0_23], %39 {strides = array<i32>} : memref<1x1xf32, #tpu.memory_space<vmem>>, vector<1x1xf32>,
    } else {
    }
    return
  }
  func.func @transform_0(%arg0: i32) -> (i32, i32) {
    %c0_i32 = arith.constant 0 : i32
    %c0_i32_0 = arith.constant 0 : i32
    return %arg0, %c0_i32 : i32, i32
  }
  func.func @transform_1(%arg0: i32) -> (i32, i32) {
    %c0_i32 = arith.constant 0 : i32
    %c0_i32_0 = arith.constant 0 : i32
    %c0_i32_1 = arith.constant 0 : i32
    return %c0_i32, %c0_i32_0 : i32, i32
  }
  func.func @transform_2(%arg0: i32) -> i32 {
    %c0_i32 = arith.constant 0 : i32
    %c0_i32_0 = arith.constant 0 : i32
    return %c0_i32 : i32
  }
  func.func @transform_3(%arg0: i32) -> (i32, i32) {
    %c0_i32 = arith.constant 0 : i32
    %c0_i32_0 = arith.constant 0 : i32
    return %c0_i32, %arg0 : i32, i32
  }
  func.func @transform_4(%arg0: i32) -> (i32, i32) {
    %c0_i32 = arith.constant 0 : i32
    %c0_i32_0 = arith.constant 0 : i32
    %c0_i32_1 = arith.constant 0 : i32
    return %c0_i32, %c0_i32_0 : i32, i32
  }
}

</mosaic_0001>

<bundles_post_ra>
// kernel: tpu_custom_call.1
= control target key start
LH: loop header
LB: loop body
LE: loop exit
PB: predicated region body
PF: predicated region fallthrough
CT: control target
= control target key end

     0   :  { %10 = vsyncpa [#allocation4], 0  ;;  %s340_s0 = inlined_call_operand.hbm [shape: f32[8,128], index: 0, kind: input, shape index: {}]   ;;  %s341_s1 = inlined_call_operand.hbm [shape: f32[8,128], index: 1, kind: input, shape index: {}]   ;;  %s342_s2 = inlined_call_operand.<no memory space> [shape: f32[1], index: 2, kind: input, shape index: {}]   ;;  %s343_s3 = inlined_call_operand.vmem [shape: s32[1,8], index: 3, kind: input, shape index: {}]   ;;  %s344_s4 = inlined_call_operand.hbm [shape: f32[1,1], index: 4, kind: output, shape index: {}]  }
   0x1   :  { %11 = vsyncpa [#allocation7], 0 }
   0x2   :  { %12 = vsyncpa [#allocation5], 0  ;;  %s265_s15 = smov [#allocation3]   ;;  %s266_s17 = smov [#allocation6]  }
   0x3   :  { %s19_s16 = sshll.u32 %s265_s15, 4  ;;  %s29_s18 = sshll.u32 %s266_s17, 4  ;;  %s20_s16 = int_to_ptr.vmem [resolvable:$true] %s19_s16  ;;  %s30_s18 = int_to_ptr.vmem [resolvable:$true] %s29_s18 }
   0x4   :  { %s193_s21 = scalar_lea.hbm %s340_s0, 128 }
   0x5   :  { %p194_p0 = scmp.ne.s32.totalorder %s340_s0, %s193_s21  ;;  %p197_p1 = scmp.lt.u32.totalorder %s193_s21, %s340_s0 }
   0x7   :  { %p199_p2 = pnand %p197_p1, %p194_p0 }
   0x9   :  { %202 = shalt.err (!%p199_p2)
}
   0xa   :  { %s203_s26 = scalar_lea.vmem %s20_s16, 128  ;;  %p208_p4 = scmp.lt.s32.totalorder %s20_s16, %s20_s16 }
   0xb   :  { %p204_p3 = scmp.ne.s32.totalorder %s20_s16, %s203_s26  ;;  %p209_p5 = scmp.lt.s32.totalorder %s203_s26, %s203_s26 }
   0xd   :  { %p210_p6 = por %p209_p5, %p208_p4 }
   0xf   :  { %p211_p7 = pnand %p210_p6, %p204_p3 }
  0x11   :  { %214 = shalt.err (!%p211_p7)
}
  0x12   :  { %22 = dma.hbm_to_vmem [thread:$0]  %s340_s0, 128, %s20_s16, [#allocation4]  }
  0x13   :  { %s215_s5 = scalar_lea.hbm %s341_s1, 128 }
  0x14   :  { %p216_p8 = scmp.ne.s32.totalorder %s341_s1, %s215_s5  ;;  %p219_p9 = scmp.lt.u32.totalorder %s215_s5, %s341_s1 }
  0x16   :  { %p221_p10 = pnand %p219_p9, %p216_p8 }
  0x18   :  { %224 = shalt.err (!%p221_p10)
}
  0x19   :  { %s225_s10 = scalar_lea.vmem %s30_s18, 128  ;;  %p230_p12 = scmp.lt.s32.totalorder %s30_s18, %s30_s18 }
  0x1a   :  { %p226_p11 = scmp.ne.s32.totalorder %s30_s18, %s225_s10  ;;  %p231_p13 = scmp.lt.s32.totalorder %s225_s10, %s225_s10 }
  0x1c   :  { %p232_p0 = por %p231_p13, %p230_p12 }
  0x1e   :  { %p233_p1 = pnand %p232_p0, %p226_p11 }
  0x20   :  { %236 = shalt.err (!%p233_p1)
}
  0x21   :  { %32 = dma.hbm_to_vmem [thread:$0]  %s341_s1, 128, %s30_s18, [#allocation7]  }
  0x22   :  { %259 = dma.done.wait [#allocation4], 128  }
  0x23   :  { %260 = vsyncadd [#allocation4], 4294967168 }
  0x24   :  { %261 = dma.done.wait [#allocation7], 128  }
  0x25   :  { %262 = vsyncadd [#allocation7], 4294967168  ;;  %vm47_vm0 = vcmask 0   ;;  %v267_v0 = vmov 0.0   ;;  %vm268_vm1 = vmmov 0   ;;  %v50_v1 = vld [vmem:[#allocation3] sm:$0xff]  ;;  %v122_v3 = vstv %s342_s2 }
  0x26   :  { %48 = vst.msk [vmem:[#allocation8] sm:$0x1] %vm47_vm0, %v267_v0  ;;  %177 = vmatprep.subr.mxu0 %v267_v0  ;;  %179 = vmatprep.mubr.msk.f32.mxu0 %vm268_vm1, %v267_v0  ;;  %v49_v2 = vld [vmem:[#allocation6] sm:$0xff]  ;;  %v124_v4 = vld [vmem:[%s343_s3] sm:$0x1]  ;;  %vm138_vm3 = vcmask 57344  }
  0x27   :  { %178 = vmatpush3.xpose.msra.mxu0 %v50_v1  ;;  %vm125_vm2 = vcmp.eq.s32.totalorder %v124_v4, 0  ;;  %s269_s3 = smov [#allocation8]  }
  0x28   :  { %s165_s15 = sshll.u32 %s269_s3, 4  ;;  %s166_s15 = int_to_ptr.vmem [resolvable:$true] %s165_s15 }
  0x29   :  { %s237_s16 = scalar_lea.vmem %s166_s15, 16  ;;  %s241_s17 = scalar_lea.vmem %s166_s15, 32 }
  0x2a   :  { %180 = vmatmul.mubr.f32.vlgmr.msra.gmra.mrb[0].mxu0 %v49_v2  ;;  %p238_p2 = scmp.ne.s32.totalorder %s166_s15, %s237_s16  ;;  %p242_p3 = scmp.lt.s32.totalorder %s166_s15, %s166_s15 }
  0x2b   :  { %p243_p4 = scmp.lt.s32.totalorder %s241_s17, %s237_s16 }
  0x2d   :  { %v137_v27 = vld [vmem:[#allocation8] sm:$0x1]  ;;  %p244_p5 = por %p243_p4, %p242_p3 }
  0x2f   :  { %p245_p6 = pnand %p244_p5, %p238_p2 }
  0xfd   :  { %v117_v5 = vpop.f32.mrb[0].mxu0 }
  0xfe   :  { %v123_v6 = vadd.f32 %v122_v3, %v117_v5  ;;  %v181_v7 = vpop.f32.mrb[1].mxu0 }
 0x100   :  { %v126_v8 = vsub.f32 0.0, %v123_v6 }
 0x102   :  { %v127_v9 = vsel %vm125_vm2, %v123_v6, %v126_v8 }
 0x103   :  { %v129_v10 = vand.u32 2147483647, %v127_v9  ;;  %v128_v16 = vmax.f32 %v127_v9, 0.0 }
 0x105   :  { %v130_v11 = vsub.f32 0.0, %v129_v10 }
 0x107   :  { %v131_v12 = vmul.f32 1.442695, %v130_v11 }
 0x109   :  { %189 = vpow2.f32 %v131_v12 }
 0x113   :  { %v190_v13 = vpop.eup %189 }
 0x114   :  { %v133_v14 = vadd.f32 1.0, %v190_v13 }
 0x116   :  { %191 = vlog2.f32 %v133_v14 }
 0x120   :  { %v192_v15 = vpop.eup %191 }
 0x121   :  { %v135_v17 = vmul.f32 0.6931472, %v192_v15 }
 0x123   :  { %v136_v18 = vadd.f32 %v135_v17, %v128_v16 }
 0x125   :  { %v139_v19 = vsel %vm138_vm3, %v136_v18, 0.0 }
 0x126   :  { %140 = vadd.xlane.f32.xlu0 %v139_v19 }
 0x1b3   :  { %v141_v20 = vpop.xlane.xlu0 %140 }
 0x1b4   :  { %v142_v21 = vrot.slane %v141_v20, 4 }
 0x1b6   :  { %v143_v22 = vadd.f32 %v142_v21, %v141_v20 }
 0x1b8   :  { %v144_v23 = vrot.slane %v143_v22, 2 }
 0x1ba   :  { %v145_v24 = vadd.f32 %v144_v23, %v143_v22 }
 0x1bc   :  { %v146_v25 = vrot.slane %v145_v24, 1 }
 0x1be   :  { %v147_v26 = vadd.f32 %v146_v25, %v145_v24 }
 0x1c0   :  { %182 = vpush %v147_v26 }
 0x1f1   :  { %s183_s2 = spop %182 }
 0x1f2   :  { %v149_v28 = vstv %s183_s2 }
 0x1f3   :  { %v150_v29 = vadd.f32 %v149_v28, %v137_v27 }
 0x1f5   :  { %152 = vst.msk [vmem:[#allocation8] sm:$0x1] %vm47_vm0, %v150_v29 }
 0x1fc   :  { %v156_v30 = vld [vmem:[#allocation8] sm:$0x1] }
 0x1fd   :  { %v157_v31 = vmul.f32 0.125, %v156_v30 }
 0x1ff   :  { %158 = vst.msk [vmem:[#allocation8] sm:$0x1] %vm47_vm0, %v157_v31 }
 0x200   :  { %248 = shalt.err (!%p245_p6)
}
 0x201   :  { %s249_s20 = scalar_lea.hbm %s344_s4, 16 }
 0x202   :  { %p250_p7 = scmp.ne.s32.totalorder %s344_s4, %s249_s20  ;;  %p253_p8 = scmp.lt.u32.totalorder %s249_s20, %s344_s4 }
 0x204   :  { %p255_p9 = pnand %p253_p8, %p250_p7 }
 0x206   :  { %258 = shalt.err (!%p255_p9)
}
 0x207   :  { %168 = dma.vmem_to_hbm [thread:$0]  %s166_s15, 16, %s344_s4, [#allocation5]  }
 0x208   :  { %263 = dma.done.wait [#allocation5], 16  }
 0x209   :  { %264 = vsyncadd [#allocation5], 4294967280 }
 0x20a   :  { %172 = vsyncpa [#allocation4], 1 }
 0x20b   :  { %173 = vsyncpa [#allocation7], 1 }
 0x20c   :  { %174 = vsyncpa [#allocation5], 1 }

</bundles_post_ra>
